<compile_context>
chip_gen: v7x
topology: tpu7x:2x2x1
jax: 0.10.0
libtpu: 0.0.40
codegen_flags: <defaults>
</compile_context>

<pallas_src>
import functools

import jax
import jax.numpy as jnp
from jax.experimental import pallas as pl
from jax.experimental.pallas import tpu as pltpu


# -------------------- fused Pallas kernel (single invocation, no grid) --------------------

def _ut_fused_kernel(
    # inputs (whole arrays, VMEM resident)
    x_ref, adj_bias_ref,
    enc_w_ref, enc_b_ref,
    w_lr_ref, b_lr_ref,
    att_rep_ref, bg_ref,
    w1_ref, b1_ref, w2_ref, b2_ref,
    wa_ref, ba_ref,
    dec_w_ref, dec_b_ref,
    # output
    preds_ref,                              # [M, P*C]
    # scratch (state of the recurrence)
    h_vmem, total_vmem, final_vmem, halted_smem,
    *, num_nodes, num_heads, dim, num_classes, num_predictions, graph_class):
  n = num_nodes
  hdim = num_heads * dim

  # ---- encoder + state init (straight-line, before the recurrence) ----
  h_vmem[...] = (jnp.dot(x_ref[...], enc_w_ref[...],
                         preferred_element_type=jnp.float32) + enc_b_ref[...])
  total_vmem[...] = jnp.zeros_like(total_vmem)
  final_vmem[...] = jnp.zeros_like(final_vmem)
  halted_smem[0] = 0

  # ---- UT recurrence: at most num_nodes steps, skipped once every node has halted ----
  @pl.loop(0, n)
  def _ut_step(_step):
    @pl.when(halted_smem[0] == 0)          # exact ACT early exit (matches PyTorch `break`)
    def _body():
      h = h_vmem[...]                                              # [N, D]

      # fused lin_l | lin_r : one 2*H*D-wide MXU matmul
      x_lr = (jnp.dot(h, w_lr_ref[...], preferred_element_type=jnp.float32)
              + b_lr_ref[...])                                     # [N, 2*H*D]
      x_l = x_lr[:, :hdim]                                         # [N, H*D] source (j)
      x_r = x_lr[:, hdim:]                                         # [N, H*D] target (i)

      # lane-dense GATv2 score slab: z[i, j, :] = x_r[i, :] + x_l[j, :]
      z = x_r[:, None, :] + x_l[None, :, :]                        # [N, N, H*D]
      lz = jnp.maximum(z, 0.2 * z)                                 # leaky_relu(0.2), one pass

      # one MXU matmul against the block attention matrix; additive adjacency bias mask.
      # scores[i*N+j, h*D+d'] == e[i, j, h]  (head score replicated across its D lanes)
      scores = (jnp.dot(lz.reshape(n * n, hdim), att_rep_ref[...],
                        preferred_element_type=jnp.float32)
                + adj_bias_ref[...])                               # [N*N, H*D]
      e = scores.reshape(n, n, hdim)                               # [N(i), N(j), H*D]

      # softmax over source nodes j (rows always have >=1 edge: self-loops added in wrapper)
      mx = jnp.max(e, axis=1, keepdims=True)                       # [N, 1, H*D]
      p = jnp.exp(e - mx)
      alpha = p / jnp.sum(p, axis=1, keepdims=True)                # exact reciprocal

      # per-head aggregation without per-head matmuls / masked column stores:
      # gat[i, h*D+d] = sum_j alpha[i, j, h] * x_l[j, h*D+d]
      gat = jnp.sum(alpha * x_l[None, :, :], axis=1) + bg_ref[...] # [N, H*D]

      # process2: Linear(4D -> D) -> ReLU -> Linear(D -> D)
      h1 = jnp.maximum(
          jnp.dot(gat, w1_ref[...], preferred_element_type=jnp.float32) + b1_ref[...],
          0.0)
      h_new = (jnp.dot(h1, w2_ref[...], preferred_element_type=jnp.float32)
               + b2_ref[...])                                      # [N, D]

      # ACT halting head as a VPU row reduction
      t = jax.nn.sigmoid(jnp.sum(h_new * wa_ref[...], axis=-1, keepdims=True)
                         + ba_ref[...])                            # [N, 1]
      total = total_vmem[...]
      new_total = jnp.minimum(total + t, 1.0)
      delta = jnp.minimum(t, new_total - total)
      upd_total = total + delta

      h_vmem[...] = h_new
      total_vmem[...] = upd_total
      final_vmem[...] = final_vmem[...] + delta * h_new
      halted_smem[0] = (jnp.min(upd_total) >= 1.0).astype(jnp.int32)

  # ---- batched decoders + log_softmax on the final states ----
  fs = final_vmem[...]                                             # [N, D]
  if graph_class:
    fs = jnp.sum(fs, axis=0, keepdims=True)                        # [1, D]
  logits = (jnp.dot(fs, dec_w_ref[...], preferred_element_type=jnp.float32)
            + dec_b_ref[...])                                      # [M, P*C]
  pieces = []
  for pi in range(num_predictions):                                # runs once; tiny
    lg = logits[:, pi * num_classes:(pi + 1) * num_classes]
    mx = jnp.max(lg, axis=-1, keepdims=True)
    s = lg - mx
    lse = jnp.log(jnp.sum(jnp.exp(s), axis=-1, keepdims=True))
    pieces.append(s - lse)
  preds_ref[...] = jnp.concatenate(pieces, axis=-1)                # one full-slab store


# -------------------- wrapper --------------------

_VMEM_SPEC = pl.BlockSpec(memory_space=pltpu.MemorySpace.VMEM)


def universal_transformers_forward(x, adj, params, num_predictions, graph_class):
  n = x.shape[0]
  dim = params["dim"]
  heads = params["att"].shape[0]
  num_classes = params["dec_w"][0].shape[1]
  hdim = heads * dim
  m = 1 if graph_class else n

  # GATv2Conv(add_self_loops=True) default: ensure self edges -> no fully-masked softmax row.
  adj = jnp.maximum(adj, jnp.eye(n, dtype=adj.dtype))
  # additive adjacency bias, pre-flattened to match the [N*N, H*D] score slab rows (i*N + j)
  adj_bias = jnp.where(adj > 0.0, 0.0, -1e30).astype(jnp.float32).reshape(n * n, 1)

  # loop-invariant weight packing (outside the kernel, free)
  w_lr = jnp.concatenate([params["wl"], params["wr"]], axis=1)     # [D, 2*H*D]
  b_lr = jnp.concatenate([params["bl"], params["br"]], axis=1)     # [1, 2*H*D]
  # block attention matrix: att_rep[h*D+d, h'*D+d'] = att[h, d] * (h == h')
  block = jnp.kron(jnp.eye(heads, dtype=jnp.float32),
                   jnp.ones((dim, dim), jnp.float32))              # [H*D, H*D]
  att_rep = params["att"].reshape(hdim, 1) * block                 # [H*D, H*D]
  dec_w = jnp.concatenate(params["dec_w"], axis=1)                 # [D, P*C]
  dec_b = jnp.concatenate(params["dec_b"], axis=1)                 # [1, P*C]
  wa_row = params["wa"].reshape(1, dim)                            # [1, D]

  kernel = functools.partial(
      _ut_fused_kernel, num_nodes=n, num_heads=heads, dim=dim,
      num_classes=num_classes, num_predictions=num_predictions,
      graph_class=graph_class)

  preds_flat = pl.pallas_call(
      kernel,
      in_specs=[_VMEM_SPEC] * 16,
      out_specs=_VMEM_SPEC,
      out_shape=jax.ShapeDtypeStruct((m, num_predictions * num_classes), jnp.float32),
      scratch_shapes=[pltpu.VMEM((n, dim), jnp.float32),           # h
                      pltpu.VMEM((n, 1), jnp.float32),             # total_terminated
                      pltpu.VMEM((n, dim), jnp.float32),           # final_states
                      pltpu.SMEM((1,), jnp.int32)],                # "all halted" flag
  )(x, adj_bias, params["enc_w"], params["enc_b"], w_lr, b_lr, att_rep,
    params["bg"], params["w1"], params["b1"], params["w2"], params["b2"],
    wa_row, params["ba"], dec_w, dec_b)

  preds = [preds_flat[:, p * num_classes:(p + 1) * num_classes]
           for p in range(num_predictions)]
  return preds, 0


# -------------------- deterministic parameter init --------------------

def init_params(key, num_features, dim, num_classes, num_predictions, heads=4):
  ks = jax.random.split(key, 16 + 2 * num_predictions)
  scale = 0.2

  def rn(k, shape):
    return scale * jax.random.normal(k, shape, jnp.float32)

  return {
      "dim": dim,
      "enc_w": rn(ks[0], (num_features, dim)), "enc_b": rn(ks[1], (1, dim)),
      "wl": rn(ks[2], (dim, heads * dim)), "bl": rn(ks[3], (1, heads * dim)),
      "wr": rn(ks[4], (dim, heads * dim)), "br": rn(ks[5], (1, heads * dim)),
      "att": rn(ks[6], (heads, dim)),
      "bg": rn(ks[7], (1, heads * dim)),
      "w1": rn(ks[8], (heads * dim, dim)), "b1": rn(ks[9], (1, dim)),
      "w2": rn(ks[10], (dim, dim)), "b2": rn(ks[11], (1, dim)),
      "wa": rn(ks[12], (dim, 1)), "ba": rn(ks[13], (1, 1)),
      "dec_w": [rn(ks[14 + 2 * p], (dim, num_classes))
                for p in range(num_predictions)],
      "dec_b": [rn(ks[15 + 2 * p], (1, num_classes))
                for p in range(num_predictions)],
  }


if __name__ == "__main__":
  num_features, dim, num_classes, num_predictions = 4, 32, 4, 2
  num_nodes = 8
  graph_class = False

  key = jax.random.PRNGKey(0)
  k_param, k_x = jax.random.split(key)
  params = init_params(k_param, num_features, dim, num_classes, num_predictions)
  x = jax.random.normal(k_x, (num_nodes, num_features), jnp.float32)

  # ring graph, edges in both directions (self loops added inside the wrapper,
  # matching GATv2Conv's add_self_loops=True default)
  idx = jnp.arange(num_nodes)
  src = jnp.concatenate([idx, (idx + 1) % num_nodes])
  dst = jnp.concatenate([(idx + 1) % num_nodes, idx])
  adj = jnp.zeros((num_nodes, num_nodes), jnp.float32).at[dst, src].set(1.0)

  preds, _ = universal_transformers_forward(x, adj, params,
                                            num_predictions, graph_class)
  for p in preds:
    jax.block_until_ready(p)
    expected = (1, num_classes) if graph_class else (num_nodes, num_classes)
    assert p.shape == expected, p.shape
    assert bool(jnp.all(jnp.isfinite(p))), "non-finite prediction"
  print("KERNEL_OK")
</pallas_src>

<mosaic_0001>
module attributes {stable_mosaic.version = 11 : i64} {
  func.func @_ut_fused_kernel(%arg0: memref<8x4xf32, #tpu.memory_space<vmem>>, %arg1: memref<64x1xf32, #tpu.memory_space<vmem>>, %arg2: memref<4x32xf32, #tpu.memory_space<vmem>>, %arg3: memref<1x32xf32, #tpu.memory_space<vmem>>, %arg4: memref<32x256xf32, #tpu.memory_space<vmem>>, %arg5: memref<1x256xf32, #tpu.memory_space<vmem>>, %arg6: memref<128x128xf32, #tpu.memory_space<vmem>>, %arg7: memref<1x128xf32, #tpu.memory_space<vmem>>, %arg8: memref<128x32xf32, #tpu.memory_space<vmem>>, %arg9: memref<1x32xf32, #tpu.memory_space<vmem>>, %arg10: memref<32x32xf32, #tpu.memory_space<vmem>>, %arg11: memref<1x32xf32, #tpu.memory_space<vmem>>, %arg12: memref<1x32xf32, #tpu.memory_space<vmem>>, %arg13: memref<1x1xf32, #tpu.memory_space<vmem>>, %arg14: memref<32x8xf32, #tpu.memory_space<vmem>>, %arg15: memref<1x8xf32, #tpu.memory_space<vmem>>, %arg16: memref<8x8xf32, #tpu.memory_space<vmem>>, %arg17: memref<8x32xf32, #tpu.memory_space<vmem>>, %arg18: memref<8x1xf32, #tpu.memory_space<vmem>>, %arg19: memref<8x32xf32, #tpu.memory_space<vmem>>, %arg20: memref<1xi32, #tpu.memory_space<smem>>) attributes {dimension_semantics = [], scalar_prefetch = 0 : i64, scratch_operands = 4 : i64, tpu.core_type = #tpu.core_type<tc>} {
    %c0 = arith.constant 0 : index
    %c0_0 = arith.constant 0 : index
    %0 = vector.load %arg0[%c0, %c0_0] : memref<8x4xf32, #tpu.memory_space<vmem>>, vector<8x4xf32>
    %c0_1 = arith.constant 0 : index
    %c0_2 = arith.constant 0 : index
    %1 = vector.load %arg2[%c0_1, %c0_2] : memref<4x32xf32, #tpu.memory_space<vmem>>, vector<4x32xf32>
    %cst = arith.constant dense<0.000000e+00> : vector<8x32xf32>
    %2 = tpu.matmul %0, %1, %cst {dimension_numbers = #tpu.dot_dimension_numbers<[1], [0], [0], [1], [0, 0, 1, 1], [], []>} : vector<8x4xf32>, vector<4x32xf32>, vector<8x32xf32> -> vector<8x32xf32>
    %c0_3 = arith.constant 0 : index
    %c0_4 = arith.constant 0 : index
    %3 = vector.load %arg3[%c0_3, %c0_4] : memref<1x32xf32, #tpu.memory_space<vmem>>, vector<1x32xf32>
    %4 = vector.broadcast %3 : vector<1x32xf32> to vector<8x32xf32>
    %5 = arith.addf %2, %4 : vector<8x32xf32>
    %c0_5 = arith.constant 0 : index
    %c0_6 = arith.constant 0 : index
    %6 = vector.load %arg17[%c0_5, %c0_6] : memref<8x32xf32, #tpu.memory_space<vmem>>, vector<8x32xf32>
    tpu.vector_store %arg17[%c0_5, %c0_6], %5 {strides = array<i32>} : memref<8x32xf32, #tpu.memory_space<vmem>>, vector<8x32xf32>,
    %cst_7 = arith.constant 0.000000e+00 : f32
    %7 = vector.broadcast %cst_7 : f32 to vector<8x1xf32>
    %c0_8 = arith.constant 0 : index
    %c0_9 = arith.constant 0 : index
    %8 = vector.load %arg18[%c0_8, %c0_9] : memref<8x1xf32, #tpu.memory_space<vmem>>, vector<8x1xf32>
    tpu.vector_store %arg18[%c0_8, %c0_9], %7 {strides = array<i32>} : memref<8x1xf32, #tpu.memory_space<vmem>>, vector<8x1xf32>,
    %cst_10 = arith.constant 0.000000e+00 : f32
    %9 = vector.broadcast %cst_10 : f32 to vector<8x32xf32>
    %c0_11 = arith.constant 0 : index
    %c0_12 = arith.constant 0 : index
    %10 = vector.load %arg19[%c0_11, %c0_12] : memref<8x32xf32, #tpu.memory_space<vmem>>, vector<8x32xf32>
    tpu.vector_store %arg19[%c0_11, %c0_12], %9 {strides = array<i32>} : memref<8x32xf32, #tpu.memory_space<vmem>>, vector<8x32xf32>,
    %c0_i32 = arith.constant 0 : i32
    %c0_13 = arith.constant 0 : index
    %11 = memref.load %arg20[%c0_13] : memref<1xi32, #tpu.memory_space<smem>>
    memref.store %c0_i32, %arg20[%c0_13] : memref<1xi32, #tpu.memory_space<smem>>
    %c0_i32_14 = arith.constant 0 : i32
    %c8_i32 = arith.constant 8 : i32
    %12 = arith.addi %c0_i32_14, %c8_i32 : i32
    %c1_i32 = arith.constant 1 : i32
    scf.for %arg21 = %c0_i32_14 to %12 step %c1_i32  : i32 {
      %c0_28 = arith.constant 0 : index
      %43 = memref.load %arg20[%c0_28] : memref<1xi32, #tpu.memory_space<smem>>
      %c0_i32_29 = arith.constant 0 : i32
      %44 = arith.cmpi eq, %43, %c0_i32_29 : i32
      %45 = arith.extui %44 : i1 to i32
      %c0_i32_30 = arith.constant 0 : i32
      %46 = arith.cmpi ne, %45, %c0_i32_30 : i32
      scf.if %46 {
        %c0_31 = arith.constant 0 : index
        %c0_32 = arith.constant 0 : index
        %47 = vector.load %arg17[%c0_31, %c0_32] : memref<8x32xf32, #tpu.memory_space<vmem>>, vector<8x32xf32>
        %c0_33 = arith.constant 0 : index
        %c0_34 = arith.constant 0 : index
        %48 = vector.load %arg4[%c0_33, %c0_34] : memref<32x256xf32, #tpu.memory_space<vmem>>, vector<32x256xf32>
        %cst_35 = arith.constant dense<0.000000e+00> : vector<8x256xf32>
        %49 = tpu.matmul %47, %48, %cst_35 {dimension_numbers = #tpu.dot_dimension_numbers<[1], [0], [0], [1], [0, 0, 1, 1], [], []>} : vector<8x32xf32>, vector<32x256xf32>, vector<8x256xf32> -> vector<8x256xf32>
        %c0_36 = arith.constant 0 : index
        %c0_37 = arith.constant 0 : index
        %50 = vector.load %arg5[%c0_36, %c0_37] : memref<1x256xf32, #tpu.memory_space<vmem>>, vector<1x256xf32>
        %51 = vector.broadcast %50 : vector<1x256xf32> to vector<8x256xf32>
        %52 = arith.addf %49, %51 : vector<8x256xf32>
        %53 = vector.extract_strided_slice %52 {offsets = [0, 0], sizes = [8, 128], strides = [1, 1]} : vector<8x256xf32> to vector<8x128xf32>
        %54 = vector.extract_strided_slice %52 {offsets = [0, 128], sizes = [8, 128], strides = [1, 1]} : vector<8x256xf32> to vector<8x128xf32>
        %55 = vector.shape_cast %54 : vector<8x128xf32> to vector<8x1x128xf32>
        %56 = vector.shape_cast %53 : vector<8x128xf32> to vector<1x8x128xf32>
        %57 = vector.broadcast %55 : vector<8x1x128xf32> to vector<8x8x128xf32>
        %58 = vector.broadcast %56 : vector<1x8x128xf32> to vector<8x8x128xf32>
        %59 = arith.addf %57, %58 : vector<8x8x128xf32>
        %cst_38 = arith.constant 2.000000e-01 : f32
        %60 = vector.broadcast %cst_38 : f32 to vector<8x8x128xf32>
        %61 = arith.mulf %60, %59 : vector<8x8x128xf32>
        %62 = arith.maximumf %59, %61 : vector<8x8x128xf32>
        %63 = vector.shape_cast %62 : vector<8x8x128xf32> to vector<64x128xf32>
        %c0_39 = arith.constant 0 : index
        %c0_40 = arith.constant 0 : index
        %64 = vector.load %arg6[%c0_39, %c0_40] : memref<128x128xf32, #tpu.memory_space<vmem>>, vector<128x128xf32>
        %cst_41 = arith.constant dense<0.000000e+00> : vector<64x128xf32>
        %65 = tpu.matmul %63, %64, %cst_41 {dimension_numbers = #tpu.dot_dimension_numbers<[1], [0], [0], [1], [0, 0, 1, 1], [], []>} : vector<64x128xf32>, vector<128x128xf32>, vector<64x128xf32> -> vector<64x128xf32>
        %c0_42 = arith.constant 0 : index
        %c0_43 = arith.constant 0 : index
        %66 = vector.load %arg1[%c0_42, %c0_43] : memref<64x1xf32, #tpu.memory_space<vmem>>, vector<64x1xf32>
        %67 = vector.broadcast %66 : vector<64x1xf32> to vector<64x128xf32>
        %68 = arith.addf %65, %67 : vector<64x128xf32>
        %69 = vector.shape_cast %68 : vector<64x128xf32> to vector<8x8x128xf32>
        %cst_44 = arith.constant dense<0xFF800000> : vector<8x128xf32>
        %70 = vector.multi_reduction <maximumf>, %69, %cst_44 [1] : vector<8x8x128xf32> to vector<8x128xf32>
        %71 = vector.shape_cast %70 : vector<8x128xf32> to vector<8x1x128xf32>
        %72 = vector.broadcast %71 : vector<8x1x128xf32> to vector<8x8x128xf32>
        %73 = arith.subf %69, %72 : vector<8x8x128xf32>
        %74 = math.exp %73 : vector<8x8x128xf32>
        %cst_45 = arith.constant dense<0.000000e+00> : vector<8x128xf32>
        %75 = vector.multi_reduction <add>, %74, %cst_45 [1] : vector<8x8x128xf32> to vector<8x128xf32>
        %76 = vector.shape_cast %75 : vector<8x128xf32> to vector<8x1x128xf32>
        %77 = vector.broadcast %76 : vector<8x1x128xf32> to vector<8x8x128xf32>
        %78 = arith.divf %74, %77 : vector<8x8x128xf32>
        %79 = vector.shape_cast %53 : vector<8x128xf32> to vector<1x8x128xf32>
        %80 = vector.broadcast %79 : vector<1x8x128xf32> to vector<8x8x128xf32>
        %81 = arith.mulf %78, %80 : vector<8x8x128xf32>
        %cst_46 = arith.constant dense<0.000000e+00> : vector<8x128xf32>
        %82 = vector.multi_reduction <add>, %81, %cst_46 [1] : vector<8x8x128xf32> to vector<8x128xf32>
        %c0_47 = arith.constant 0 : index
        %c0_48 = arith.constant 0 : index
        %83 = vector.load %arg7[%c0_47, %c0_48] : memref<1x128xf32, #tpu.memory_space<vmem>>, vector<1x128xf32>
        %84 = vector.broadcast %83 : vector<1x128xf32> to vector<8x128xf32>
        %85 = arith.addf %82, %84 : vector<8x128xf32>
        %c0_49 = arith.constant 0 : index
        %c0_50 = arith.constant 0 : index
        %86 = vector.load %arg8[%c0_49, %c0_50] : memref<128x32xf32, #tpu.memory_space<vmem>>, vector<128x32xf32>
        %cst_51 = arith.constant dense<0.000000e+00> : vector<8x32xf32>
        %87 = tpu.matmul %85, %86, %cst_51 {dimension_numbers = #tpu.dot_dimension_numbers<[1], [0], [0], [1], [0, 0, 1, 1], [], []>} : vector<8x128xf32>, vector<128x32xf32>, vector<8x32xf32> -> vector<8x32xf32>
        %c0_52 = arith.constant 0 : index
        %c0_53 = arith.constant 0 : index
        %88 = vector.load %arg9[%c0_52, %c0_53] : memref<1x32xf32, #tpu.memory_space<vmem>>, vector<1x32xf32>
        %89 = vector.broadcast %88 : vector<1x32xf32> to vector<8x32xf32>
        %90 = arith.addf %87, %89 : vector<8x32xf32>
        %cst_54 = arith.constant 0.000000e+00 : f32
        %91 = vector.broadcast %cst_54 : f32 to vector<8x32xf32>
        %92 = arith.maximumf %90, %91 : vector<8x32xf32>
        %c0_55 = arith.constant 0 : index
        %c0_56 = arith.constant 0 : index
        %93 = vector.load %arg10[%c0_55, %c0_56] : memref<32x32xf32, #tpu.memory_space<vmem>>, vector<32x32xf32>
        %cst_57 = arith.constant dense<0.000000e+00> : vector<8x32xf32>
        %94 = tpu.matmul %92, %93, %cst_57 {dimension_numbers = #tpu.dot_dimension_numbers<[1], [0], [0], [1], [0, 0, 1, 1], [], []>} : vector<8x32xf32>, vector<32x32xf32>, vector<8x32xf32> -> vector<8x32xf32>
        %c0_58 = arith.constant 0 : index
        %c0_59 = arith.constant 0 : index
        %95 = vector.load %arg11[%c0_58, %c0_59] : memref<1x32xf32, #tpu.memory_space<vmem>>, vector<1x32xf32>
        %96 = vector.broadcast %95 : vector<1x32xf32> to vector<8x32xf32>
        %97 = arith.addf %94, %96 : vector<8x32xf32>
        %c0_60 = arith.constant 0 : index
        %c0_61 = arith.constant 0 : index
        %98 = vector.load %arg12[%c0_60, %c0_61] : memref<1x32xf32, #tpu.memory_space<vmem>>, vector<1x32xf32>
        %99 = vector.broadcast %98 : vector<1x32xf32> to vector<8x32xf32>
        %100 = arith.mulf %97, %99 : vector<8x32xf32>
        %cst_62 = arith.constant dense<0.000000e+00> : vector<8xf32>
        %101 = vector.multi_reduction <add>, %100, %cst_62 [1] : vector<8x32xf32> to vector<8xf32>
        %102 = vector.shape_cast %101 : vector<8xf32> to vector<8x1xf32>
        %c0_63 = arith.constant 0 : index
        %c0_64 = arith.constant 0 : index
        %103 = vector.load %arg13[%c0_63, %c0_64] : memref<1x1xf32, #tpu.memory_space<vmem>>, vector<1x1xf32>
        %104 = vector.broadcast %103 : vector<1x1xf32> to vector<8x1xf32>
        %105 = arith.addf %102, %104 : vector<8x1xf32>
        %106 = arith.negf %105 : vector<8x1xf32>
        %107 = math.exp %106 : vector<8x1xf32>
        %cst_65 = arith.constant 1.000000e+00 : f32
        %108 = vector.broadcast %cst_65 : f32 to vector<8x1xf32>
        %109 = arith.addf %108, %107 : vector<8x1xf32>
        %110 = arith.divf %108, %109 : vector<8x1xf32>
        %c0_66 = arith.constant 0 : index
        %c0_67 = arith.constant 0 : index
        %111 = vector.load %arg18[%c0_66, %c0_67] : memref<8x1xf32, #tpu.memory_space<vmem>>, vector<8x1xf32>
        %112 = arith.addf %111, %110 : vector<8x1xf32>
        %cst_68 = arith.constant 1.000000e+00 : f32
        %113 = vector.broadcast %cst_68 : f32 to vector<8x1xf32>
        %114 = arith.minimumf %112, %113 : vector<8x1xf32>
        %115 = arith.subf %114, %111 : vector<8x1xf32>
        %116 = arith.minimumf %110, %115 : vector<8x1xf32>
        %117 = arith.addf %111, %116 : vector<8x1xf32>
        %c0_69 = arith.constant 0 : index
        %c0_70 = arith.constant 0 : index
        %118 = vector.load %arg17[%c0_69, %c0_70] : memref<8x32xf32, #tpu.memory_space<vmem>>, vector<8x32xf32>
        tpu.vector_store %arg17[%c0_69, %c0_70], %97 {strides = array<i32>} : memref<8x32xf32, #tpu.memory_space<vmem>>, vector<8x32xf32>,
        %c0_71 = arith.constant 0 : index
        %c0_72 = arith.constant 0 : index
        %119 = vector.load %arg18[%c0_71, %c0_72] : memref<8x1xf32, #tpu.memory_space<vmem>>, vector<8x1xf32>
        tpu.vector_store %arg18[%c0_71, %c0_72], %117 {strides = array<i32>} : memref<8x1xf32, #tpu.memory_space<vmem>>, vector<8x1xf32>,
        %c0_73 = arith.constant 0 : index
        %c0_74 = arith.constant 0 : index
        %120 = vector.load %arg19[%c0_73, %c0_74] : memref<8x32xf32, #tpu.memory_space<vmem>>, vector<8x32xf32>
        %121 = vector.broadcast %116 : vector<8x1xf32> to vector<8x32xf32>
        %122 = arith.mulf %121, %97 : vector<8x32xf32>
        %123 = arith.addf %120, %122 : vector<8x32xf32>
        %c0_75 = arith.constant 0 : index
        %c0_76 = arith.constant 0 : index
        %124 = vector.load %arg19[%c0_75, %c0_76] : memref<8x32xf32, #tpu.memory_space<vmem>>, vector<8x32xf32>
        tpu.vector_store %arg19[%c0_75, %c0_76], %123 {strides = array<i32>} : memref<8x32xf32, #tpu.memory_space<vmem>>, vector<8x32xf32>,
        %125 = vector.shape_cast %117 : vector<8x1xf32> to vector<1x8x1xf32>
        %cst_77 = arith.constant dense<0x7F800000> : vector<1xf32>
        %126 = vector.multi_reduction <minimumf>, %125, %cst_77 [1, 2] : vector<1x8x1xf32> to vector<1xf32>
        %127 = vector.shape_cast %126 : vector<1xf32> to vector<1x1x1xf32>
        %128 = vector.extract %127[0, 0, 0] : f32 from vector<1x1x1xf32>
        %cst_78 = arith.constant 1.000000e+00 : f32
        %129 = arith.cmpf oge, %128, %cst_78 : f32
        %130 = arith.extui %129 : i1 to i32
        %c0_79 = arith.constant 0 : index
        %131 = memref.load %arg20[%c0_79] : memref<1xi32, #tpu.memory_space<smem>>
        memref.store %130, %arg20[%c0_79] : memref<1xi32, #tpu.memory_space<smem>>
      } else {
      }
    }
    %c0_15 = arith.constant 0 : index
    %c0_16 = arith.constant 0 : index
    %13 = vector.load %arg19[%c0_15, %c0_16] : memref<8x32xf32, #tpu.memory_space<vmem>>, vector<8x32xf32>
    %c0_17 = arith.constant 0 : index
    %c0_18 = arith.constant 0 : index
    %14 = vector.load %arg14[%c0_17, %c0_18] : memref<32x8xf32, #tpu.memory_space<vmem>>, vector<32x8xf32>
    %cst_19 = arith.constant dense<0.000000e+00> : vector<8x8xf32>
    %15 = tpu.matmul %13, %14, %cst_19 {dimension_numbers = #tpu.dot_dimension_numbers<[1], [0], [0], [1], [0, 0, 1, 1], [], []>} : vector<8x32xf32>, vector<32x8xf32>, vector<8x8xf32> -> vector<8x8xf32>
    %c0_20 = arith.constant 0 : index
    %c0_21 = arith.constant 0 : index
    %16 = vector.load %arg15[%c0_20, %c0_21] : memref<1x8xf32, #tpu.memory_space<vmem>>, vector<1x8xf32>
    %17 = vector.broadcast %16 : vector<1x8xf32> to vector<8x8xf32>
    %18 = arith.addf %15, %17 : vector<8x8xf32>
    %19 = vector.extract_strided_slice %18 {offsets = [0, 0], sizes = [8, 4], strides = [1, 1]} : vector<8x8xf32> to vector<8x4xf32>
    %cst_22 = arith.constant dense<0xFF800000> : vector<8xf32>
    %20 = vector.multi_reduction <maximumf>, %19, %cst_22 [1] : vector<8x4xf32> to vector<8xf32>
    %21 = vector.shape_cast %20 : vector<8xf32> to vector<8x1xf32>
    %22 = vector.broadcast %21 : vector<8x1xf32> to vector<8x4xf32>
    %23 = arith.subf %19, %22 : vector<8x4xf32>
    %24 = math.exp %23 : vector<8x4xf32>
    %cst_23 = arith.constant dense<0.000000e+00> : vector<8xf32>
    %25 = vector.multi_reduction <add>, %24, %cst_23 [1] : vector<8x4xf32> to vector<8xf32>
    %26 = vector.shape_cast %25 : vector<8xf32> to vector<8x1xf32>
    %27 = math.log %26 : vector<8x1xf32>
    %28 = vector.broadcast %27 : vector<8x1xf32> to vector<8x4xf32>
    %29 = arith.subf %23, %28 : vector<8x4xf32>
    %30 = vector.extract_strided_slice %18 {offsets = [0, 4], sizes = [8, 4], strides = [1, 1]} : vector<8x8xf32> to vector<8x4xf32>
    %cst_24 = arith.constant dense<0xFF800000> : vector<8xf32>
    %31 = vector.multi_reduction <maximumf>, %30, %cst_24 [1] : vector<8x4xf32> to vector<8xf32>
    %32 = vector.shape_cast %31 : vector<8xf32> to vector<8x1xf32>
    %33 = vector.broadcast %32 : vector<8x1xf32> to vector<8x4xf32>
    %34 = arith.subf %30, %33 : vector<8x4xf32>
    %35 = math.exp %34 : vector<8x4xf32>
    %cst_25 = arith.constant dense<0.000000e+00> : vector<8xf32>
    %36 = vector.multi_reduction <add>, %35, %cst_25 [1] : vector<8x4xf32> to vector<8xf32>
    %37 = vector.shape_cast %36 : vector<8xf32> to vector<8x1xf32>
    %38 = math.log %37 : vector<8x1xf32>
    %39 = vector.broadcast %38 : vector<8x1xf32> to vector<8x4xf32>
    %40 = arith.subf %34, %39 : vector<8x4xf32>
    %41 = tpu.concatenate %29, %40 in 1 : vector<8x4xf32>, vector<8x4xf32> -> vector<8x8xf32>
    %c0_26 = arith.constant 0 : index
    %c0_27 = arith.constant 0 : index
    %42 = vector.load %arg16[%c0_26, %c0_27] : memref<8x8xf32, #tpu.memory_space<vmem>>, vector<8x8xf32>
    tpu.vector_store %arg16[%c0_26, %c0_27], %41 {strides = array<i32>} : memref<8x8xf32, #tpu.memory_space<vmem>>, vector<8x8xf32>,
    return
  }
}

</mosaic_0001>

<bundles_post_ra>
// kernel: tpu_custom_call.1
= control target key start
LH: loop header
LB: loop body
LE: loop exit
PB: predicated region body
PF: predicated region fallthrough
CT: control target
= control target key end

     0   :  { %s1904_s0 = inlined_call_operand.vmem [shape: f32[8,4], index: 0, kind: input, shape index: {}]   ;;  %s1905_s1 = inlined_call_operand.vmem [shape: f32[64,1], index: 1, kind: input, shape index: {}]   ;;  %s1906_s2 = inlined_call_operand.vmem [shape: f32[4,32], index: 2, kind: input, shape index: {}]   ;;  %s1907_s3 = inlined_call_operand.vmem [shape: f32[1,32], index: 3, kind: input, shape index: {}]   ;;  %s1908_s4 = inlined_call_operand.vmem [shape: f32[32,256], index: 4, kind: input, shape index: {}]   ;;  %s1909_s5 = inlined_call_operand.vmem [shape: f32[1,256], index: 5, kind: input, shape index: {}]   ;;  %s1910_s6 = inlined_call_operand.vmem [shape: f32[128,128], index: 6, kind: input, shape index: {}]   ;;  %s1911_s7 = inlined_call_operand.vmem [shape: f32[1,128], index: 7, kind: input, shape index: {}]   ;;  %s1912_s8 = inlined_call_operand.vmem [shape: f32[128,32], index: 8, kind: input, shape index: {}]   ;;  %s1913_s9 = inlined_call_operand.vmem [shape: f32[1,32], index: 9, kind: input, shape index: {}]   ;;  %s1914_s10 = inlined_call_operand.vmem [shape: f32[32,32], index: 10, kind: input, shape index: {}]   ;;  %s1915_s11 = inlined_call_operand.vmem [shape: f32[1,32], index: 11, kind: input, shape index: {}]   ;;  %s1916_s12 = inlined_call_operand.vmem [shape: f32[1,32], index: 12, kind: input, shape index: {}]   ;;  %s1917_s13 = inlined_call_operand.<no memory space> [shape: f32[1,1], index: 13, kind: input, shape index: {}]   ;;  %s1918_s14 = inlined_call_operand.vmem [shape: f32[32,8], index: 14, kind: input, shape index: {}]   ;;  %s1919_s15 = inlined_call_operand.vmem [shape: f32[1,8], index: 15, kind: input, shape index: {}]   ;;  %s1920_s16 = inlined_call_operand.hbm [shape: f32[8,8], index: 16, kind: output, shape index: {}]  }
   0x1   :  { %1921 = sst [smem:[#allocation10_spill]] %s1904_s0  ;;  %v21_v0 = vstv %s1917_s13 }
   0x2   :  { %22 = vst [vmem:[#allocation6] sm:$0x1] %v21_v0 }
   0x3   :  { %23 = vsyncpa [#allocation8], 0  ;;  %vm145_vm0 = vcmask 7168   ;;  %v57_v1 = vld [vmem:[%s1906_s2] sm:$0xf]  ;;  %v1493_v2 = vmov 0.0  }
   0x4   :  { %1212 = vmatprep.subr.mxu0 %v1493_v2  ;;  %146 = vst.msk [vmem:[#allocation3] sm:$0xff] %vm145_vm0, %v1493_v2  ;;  %vm69_vm1 = vcmask 1043456   ;;  %s1922_s27 = sld [smem:[#allocation10_spill]]  ;;  %vm65_vm2 = vcmask 31744   ;;  %vm1494_vm3 = vmmov 0   ;;  %vm143_vm4 = vcmask 261120  }
   0x5   :  { %1213 = vmatpush3.msk.msra.mxu0 %vm69_vm1, %v57_v1  ;;  %1214 = vmatprep.mubr.msk.f32.mxu0 %vm1494_vm3, %v1493_v2  ;;  %147 = vst.msk [vmem:[#allocation4] sm:$0xff] %vm143_vm4, %v1493_v2  ;;  %s1495_s2 = smov 0   ;;  %v1145_v4 = vld [vmem:[%s1907_s3] ss:$0 sm:$0xff]  ;;  %s1610_s29 = smov 0  }
   0x6   :  { %149 = sst [smem:[#allocation5]] %s1495_s2 }
   0xa   :  { %v56_v3 = vld [vmem:[%s1922_s27] sm:$0xff] }
   0xb   :  { %1215 = vmatmul.mubr.msk.f32.vlgmr.msra.gmra.mrb[0].mxu0 %vm65_vm2, %v56_v3 }
  0xde   :  { %v139_v5 = vpop.f32.mrb[0].mxu0 }
  0xdf   :  { %v140_v6 = vadd.f32 %v1145_v4, %v139_v5  ;;  %v1216_v7 = vpop.f32.mrb[1].mxu0 }
  0xe1   :  { %144 = vst.msk [vmem:[#allocation2] sm:$0xff] %vm143_vm4, %v140_v6 }
  0xe2 LB: > { %s156_s30 = sld [smem:[#allocation5]]  ;;  %s1491_s29 = sphi %s1610_s29, %s155_s29  }
  0xe8   : > { %p1148_p0 = scmp.ne.s32.totalorder %s156_s30, 0 }
  0xe9   : > { %v163_v8 = vld [vmem:[%s1908_s4 + $0x8] sm:$0xff] (!%p1148_p0)  ;;  %v165_v9 = vld [vmem:[%s1908_s4 + $0x18] sm:$0xff] (!%p1148_p0)  ;;  %v162_v10 = vld [vmem:[%s1908_s4] sm:$0xff] (!%p1148_p0)  ;;  %v1496_v15 = vmov (!%p1148_p0), 0.0   ;;  %v1497_v48 = vmov (!%p1148_p0), 0   ;;  %v172_v55 = vlaneseq (!%p1148_p0)  ;;  %vm1500_vm5 = vmmov (!%p1148_p0), 0  }
  0xea   : > { %160 = sbr.rel (%p1148_p0) target bundleno = 1595 (0x63b), region = 76  ;;  %v1318_v11 = vpack.c.bf16 (!%p1148_p0), %v165_v9, %v163_v8  ;;  %v164_v12 = vld [vmem:[%s1908_s4 + $0x10] sm:$0xff] (!%p1148_p0)  ;;  %v167_v13 = vld [vmem:[%s1908_s4 + $0x28] sm:$0xff] (!%p1148_p0)  ;;  %v169_v14 = vld [vmem:[%s1908_s4 + $0x38] sm:$0xff] (!%p1148_p0)  ;;  %249 = vmatprep.mubr.f32.mxu0 (!%p1148_p0), %v1496_v15  ;;  %1415 = vset.pattern.permute.xlu0 (!%p1148_p0), %v1497_v48  ;;  %v1498_v57 = vmov (!%p1148_p0), 1966171168  }
  0xeb   : > { %v1320_v16 = vpack.c.bf16 (!%p1148_p0), %v164_v12, %v162_v10  ;;  %v1322_v17 = vpack.c.bf16 (!%p1148_p0), %v169_v14, %v167_v13  ;;  %v166_v18 = vld [vmem:[%s1908_s4 + $0x20] sm:$0xff] (!%p1148_p0)  ;;  %v168_v19 = vld [vmem:[%s1908_s4 + $0x30] sm:$0xff] (!%p1148_p0)  ;;  %v371_v21 = vld [vmem:[%s1910_s6 + $0x8] sm:$0xff] (!%p1148_p0)  ;;  %1416 = vset.pattern.permute.xlu1 (!%p1148_p0), %v1497_v48  ;;  %v173_v56 = vshrl.u32 (!%p1148_p0), %v172_v55, 7  ;;  %v259_v58 = vunpack.c.l.s4 (!%p1148_p0), %v1498_v57 }
  0xec   : > { %1319 = vmatprep.subr.bf16.mxu0 (!%p1148_p0), %v1318_v11  ;;  %v370_v20 = vld [vmem:[%s1910_s6] sm:$0xff] (!%p1148_p0)  ;;  %v372_v22 = vld [vmem:[%s1910_s6 + $0x10] sm:$0xff] (!%p1148_p0)  ;;  %v1324_v23 = vpack.c.bf16 (!%p1148_p0), %v168_v19, %v166_v18  ;;  %v373_v25 = vld [vmem:[%s1910_s6 + $0x18] sm:$0xff] (!%p1148_p0)  ;;  %vm778_vm6 = vcmask (!%p1148_p0), 1041409   ;;  %vm781_vm7 = vcmask (!%p1148_p0), 1042434   ;;  %vm784_vm8 = vcmask (!%p1148_p0), 1043459  }
  0xed   : > { %1321 = vmatpush1.bf16.msra.mxu0 (!%p1148_p0), %v1320_v16  ;;  %v1326_v24 = vpack.c.bf16 (!%p1148_p0), %v371_v21, %v370_v20  ;;  %v1330_v26 = vpack.c.bf16 (!%p1148_p0), %v373_v25, %v372_v22  ;;  %v374_v27 = vld [vmem:[%s1910_s6 + $0x20] sm:$0xff] (!%p1148_p0)  ;;  %v375_v28 = vld [vmem:[%s1910_s6 + $0x28] sm:$0xff] (!%p1148_p0)  ;;  %v376_v31 = vld [vmem:[%s1910_s6 + $0x30] sm:$0xff] (!%p1148_p0)  ;;  %v178_v59 = vsub.s32 (!%p1148_p0), 1, %v173_v56  ;;  %v260_v61 = vunpack.c.0.s8 (!%p1148_p0), %v259_v58 }
  0xee   : > { %1323 = vmatprep.subr.bf16.mxu0 (!%p1148_p0), %v1322_v17  ;;  %v161_v29 = vld [vmem:[#allocation2] sm:$0xff] (!%p1148_p0)  ;;  %v1334_v30 = vpack.c.bf16 (!%p1148_p0), %v375_v28, %v374_v27  ;;  %v377_v32 = vld [vmem:[%s1910_s6 + $0x38] sm:$0xff] (!%p1148_p0)  ;;  %v379_v35 = vld [vmem:[%s1910_s6 + $0x48] sm:$0xff] (!%p1148_p0)  ;;  %v174_v1 = vsub.s32 (!%p1148_p0), 0, %v173_v56  ;;  %vm787_vm9 = vcmask (!%p1148_p0), 1044484   ;;  %vm790_vm10 = vcmask (!%p1148_p0), 1045509  }
  0xef   : > { %1327 = vmatprep.subr.bf16.mxu1 (!%p1148_p0), %v1326_v24  ;;  %v1338_v33 = vpack.c.bf16 (!%p1148_p0), %v377_v32, %v376_v31  ;;  %v378_v34 = vld [vmem:[%s1910_s6 + $0x40] sm:$0xff] (!%p1148_p0)  ;;  %v380_v37 = vld [vmem:[%s1910_s6 + $0x50] sm:$0xff] (!%p1148_p0)  ;;  %v381_v38 = vld [vmem:[%s1910_s6 + $0x58] sm:$0xff] (!%p1148_p0)  ;;  %v263_v0 = vsub.s32 (!%p1148_p0), %v260_v61, %v173_v56  ;;  %v1499_v56 = vmov (!%p1148_p0), 0.0|0.0   ;;  %vm793_vm11 = vcmask (!%p1148_p0), 1046534  }
  0xf0   : > { %1329 = vmatpush3.bf16.msra.mxu1 (!%p1148_p0), %v1326_v24  ;;  %v1342_v36 = vpack.c.bf16 (!%p1148_p0), %v379_v35, %v378_v34  ;;  %v1346_v39 = vpack.c.bf16 (!%p1148_p0), %v381_v38, %v380_v37  ;;  %v382_v40 = vld [vmem:[%s1910_s6 + $0x60] sm:$0xff] (!%p1148_p0)  ;;  %v383_v41 = vld [vmem:[%s1910_s6 + $0x68] sm:$0xff] (!%p1148_p0)  ;;  %v384_v43 = vld [vmem:[%s1910_s6 + $0x70] sm:$0xff] (!%p1148_p0)  ;;  %vm796_vm12 = vcmask (!%p1148_p0), 1047559  }
  0xf1   : > { %1325 = vmatpush1.bf16.msra.mxu0 %v1324_v23  ;;  %1331 = vmatprep.subr.bf16.mxu1 %v1330_v26  ;;  %v1350_v42 = vpack.c.bf16 %v383_v41, %v382_v40  ;;  %v385_v44 = vld [vmem:[%s1910_s6 + $0x78] sm:$0xff]  ;;  %v387_v46 = vld [vmem:[%s1905_s1 + $0x8] sm:$0xff]  ;;  %v386_v47 = vld [vmem:[%s1905_s1] sm:$0xff] }
  0xf2   : > { %v1354_v45 = vpack.c.bf16 %v385_v44, %v384_v43  ;;  %401 = vperm.xlu0 %1415, %v387_v46   ;;  %396 = vperm.xlu1 %1416, %v386_v47   ;;  %v388_v49 = vld [vmem:[%s1905_s1 + $0x10] sm:$0xff]  ;;  %v389_v50 = vld [vmem:[%s1905_s1 + $0x18] sm:$0xff]  ;;  %v390_v51 = vld [vmem:[%s1905_s1 + $0x20] sm:$0xff] }
  0xf3   : > { %v391_v52 = vld [vmem:[%s1905_s1 + $0x28] sm:$0xff]  ;;  %v392_v53 = vld [vmem:[%s1905_s1 + $0x30] sm:$0xff]  ;;  %v393_v54 = vld [vmem:[%s1905_s1 + $0x38] sm:$0xff]  ;;  %1358 = vmatprep.subr.bf16.mxu0 %v1499_v56 }
  0xf4   : > { %1149 = vmatmul.mubr.msk.f32.vlgmr.msra.gmra.mrb[0].mxu0 %vm143_vm4, %v161_v29  ;;  %1333 = vmatpush3.bf16.msra.mxu1 %v1330_v26  ;;  %v170_v60 = vld [vmem:[%s1909_s5] sm:$0x3]  ;;  %v748_v55 = vld [vmem:[%s1912_s8 + $0x10] sm:$0xff]  ;;  %v749_v58 = vld [vmem:[%s1912_s8 + $0x18] sm:$0xff] }
  0xf5   : > { %1335 = vmatprep.subr.bf16.mxu1 %v1334_v30  ;;  %v179_v62 = vrot.slane %v170_v60, %v178_v59  ;;  %v175_v7 = vrot.slane %v170_v60, %v174_v1  ;;  %1293 = vmatprep.mubr.msk.f32.mxu0 %vm1500_vm5, %v1496_v15  ;;  %v1362_v59 = vpack.c.bf16 %v749_v58, %v748_v55  ;;  %v750_v60 = vld [vmem:[%s1912_s8 + $0x20] sm:$0xff]  ;;  %v751_v61 = vld [vmem:[%s1912_s8 + $0x28] sm:$0xff] }
  0xf6   : > { %406 = vperm.xlu0 %1415, %v388_v49   ;;  %411 = vperm.xlu1 %1416, %v389_v50  }
  0xf8   : > { %1337 = vmatpush3.bf16.msra.mxu1 %v1334_v30 }
  0xf9   : > { %1339 = vmatprep.subr.bf16.mxu1 %v1338_v33 }
  0xfa   : > { %416 = vperm.xlu0 %1415, %v390_v51   ;;  %421 = vperm.xlu1 %1416, %v391_v52  }
  0xfc   : > { %1341 = vmatpush3.bf16.msra.mxu1 %v1338_v33 }
  0xfd   : > { %1343 = vmatprep.subr.bf16.mxu1 %v1342_v36 }
  0xfe   : > { %426 = vperm.xlu0 %1415, %v392_v53   ;;  %431 = vperm.xlu1 %1416, %v393_v54   ;;  %v746_v53 = vld [vmem:[%s1912_s8] sm:$0xff]  ;;  %v747_v54 = vld [vmem:[%s1912_s8 + $0x8] sm:$0xff] }
  0xff   : > { %v1359_v57 = vpack.c.bf16 %v747_v54, %v746_v53 }
 0x100   : > { %1345 = vmatpush3.bf16.msra.mxu1 %v1342_v36 }
 0x101   : > { %1347 = vmatprep.subr.bf16.mxu1 %v1346_v39  ;;  %1360 = vmatpush3.bf16.msra.mxu0 %v1359_v57 }
 0x102   : > { %1361 = vmatprep.subr.bf16.mxu0 %v1499_v56 }
 0x104   : > { %1349 = vmatpush3.bf16.msra.mxu1 %v1346_v39 }
 0x105   : > { %1351 = vmatprep.subr.bf16.mxu1 %v1350_v42  ;;  %1363 = vmatpush3.bf16.msra.mxu0 %v1362_v59 }
 0x106   : > { %1364 = vmatprep.subr.bf16.mxu0 %v1499_v56 }
 0x108   : > { %1353 = vmatpush3.bf16.msra.mxu1 %v1350_v42 }
 0x109   : > { %1355 = vmatprep.subr.bf16.mxu1 %v1354_v45 }
 0x10c   : > { %1357 = vmatpush3.bf16.msra.mxu1 %v1354_v45 }
 0x1c7   : > { %v251_v63 = vpop.f32.mrb[0].mxu0 }
 0x1c8   : > { %v253_v3 = vpop.f32.mrb[1].mxu0  ;;  %v1716_v16 = vadd.f32 %v251_v63, %v175_v7  ;;  %v752_v63 = vld [vmem:[%s1912_s8 + $0x30] sm:$0xff]  ;;  %v757_v7 = vld [vmem:[%s1912_s8 + $0x58] sm:$0xff] }
 0x1c9   : > { %v254_v4 = vadd.f32 %v253_v3, %v179_v62  ;;  %v1365_v62 = vpack.c.bf16 %v751_v61, %v750_v60  ;;  %v754_v3 = vld [vmem:[%s1912_s8 + $0x40] sm:$0xff] }
 0x1cb   : > { %v257_v5 = vcombine.high %v254_v4, %v254_v4  ;;  %v264_v6 = vrot.slane %v254_v4, %v263_v0  ;;  %1366 = vmatpush3.bf16.msra.mxu0 %v1365_v62  ;;  %v755_v4 = vld [vmem:[%s1912_s8 + $0x48] sm:$0xff] }
 0x1cc   : > { %1367 = vmatprep.subr.bf16.mxu0 %v1499_v56 }
 0x1cd   : > { %v271_v8 = vrot.slane %v257_v5, %v263_v0  ;;  %v272_v9 = vcombine.high %v264_v6, %v264_v6  ;;  %v280_v10 = vrot.slane %v264_v6, %v263_v0  ;;  %v1371_v5 = vpack.c.bf16 %v755_v4, %v754_v3  ;;  %v756_v6 = vld [vmem:[%s1912_s8 + $0x50] sm:$0xff] }
 0x1cf   : > { %v273_v11 = vcombine.high %v271_v8, %v271_v8  ;;  %v287_v12 = vrot.slane %v271_v8, %v263_v0  ;;  %v294_v13 = vrot.slane %v272_v9, %v263_v0  ;;  %v302_v14 = vcombine.high %v280_v10, %v280_v10  ;;  %v758_v9 = vld [vmem:[%s1912_s8 + $0x60] sm:$0xff] }
 0x1d0   : > { %v309_v17 = vrot.slane %v280_v10, %v174_v1  ;;  %v1374_v8 = vpack.c.bf16 %v757_v7, %v756_v6  ;;  %v759_v10 = vld [vmem:[%s1912_s8 + $0x68] sm:$0xff] }
 0x1d1   : > { %v301_v18 = vrot.slane %v273_v11, %v263_v0  ;;  %v303_v19 = vcombine.high %v287_v12, %v287_v12  ;;  %v304_v20 = vcombine.high %v294_v13, %v294_v13  ;;  %v313_v21 = vrot.slane %v294_v13, %v174_v1  ;;  %v753_v0 = vld [vmem:[%s1912_s8 + $0x38] sm:$0xff] }
 0x1d2   : > { %v346_v22 = vadd.f32 %v309_v17, %v1716_v16  ;;  %v317_v23 = vrot.slane %v302_v14, %v174_v1  ;;  %v325_v24 = vrot.slane %v287_v12, %v174_v1  ;;  %v1377_v11 = vpack.c.bf16 %v759_v10, %v758_v9  ;;  %v760_v12 = vld [vmem:[%s1912_s8 + $0x70] sm:$0xff]  ;;  %v761_v13 = vld [vmem:[%s1912_s8 + $0x78] sm:$0xff]  ;;  %v397_v17 = vpop.permute.xlu1 %396 }
 0x1d3   : > { %v347_v25 = vadd.f32 %v313_v21, %v1716_v16  ;;  %v321_v26 = vrot.slane %v304_v20, %v174_v1  ;;  %v329_v27 = vrot.slane %v301_v18, %v174_v1  ;;  %v333_v28 = vrot.slane %v303_v19, %v174_v1 }
 0x1d4   : > { %v354_v29 = vmul.f32 0.2, %v346_v22  ;;  %v348_v30 = vadd.f32 %v317_v23, %v1716_v16  ;;  %v350_v31 = vadd.f32 %v325_v24, %v1716_v16  ;;  %v305_v32 = vcombine.high %v301_v18, %v301_v18  ;;  %v402_v18 = vpop.permute.xlu0 %401 }
 0x1d5   : > { %v355_v33 = vmul.f32 0.2, %v347_v25  ;;  %v349_v34 = vadd.f32 %v321_v26, %v1716_v16  ;;  %v351_v39 = vadd.f32 %v329_v27, %v1716_v16  ;;  %v352_v43 = vadd.f32 %v333_v28, %v1716_v16 }
 0x1d6   : > { %v362_v35 = vmax.f32 %v346_v22, %v354_v29  ;;  %v356_v36 = vmul.f32 0.2, %v348_v30  ;;  %v337_v40 = vrot.slane %v305_v32, %v174_v1  ;;  %v358_v42 = vmul.f32 0.2, %v350_v31  ;;  %v412_v19 = vpop.permute.xlu1 %411 }
 0x1d7   : > { %v363_v37 = vmax.f32 %v347_v25, %v355_v33  ;;  %v357_v38 = vmul.f32 0.2, %v349_v34  ;;  %v359_v45 = vmul.f32 0.2, %v351_v39  ;;  %v360_v48 = vmul.f32 0.2, %v352_v43 }
 0x1d8   : > { %1249 = vmatprep.mubr.f32.mxu1 %v362_v35  ;;  %v364_v41 = vmax.f32 %v348_v30, %v356_v36  ;;  %v353_v46 = vadd.f32 %v337_v40, %v1716_v16  ;;  %v366_v47 = vmax.f32 %v350_v31, %v358_v42  ;;  %v1368_v1 = vpack.c.bf16 %v753_v0, %v752_v63  ;;  %v407_v21 = vpop.permute.xlu0 %406 }
 0x1d9   : > { %1250 = vmatmul.mubr.f32.vlgmr.msra.gmra.mrb[0].mxu1 %v363_v37  ;;  %v365_v44 = vmax.f32 %v349_v34, %v357_v38  ;;  %v367_v49 = vmax.f32 %v351_v39, %v359_v45  ;;  %v368_v51 = vmax.f32 %v352_v43, %v360_v48  ;;  %v1380_v14 = vpack.c.bf16 %v761_v13, %v760_v12 }
 0x1da   : > { %1252 = vmatprep.mubr.f32.mxu1 %v364_v41  ;;  %v361_v50 = vmul.f32 0.2, %v353_v46  ;;  %1369 = vmatpush3.bf16.msra.mxu0 %v1368_v1  ;;  %v422_v31 = vpop.permute.xlu1 %421 }
 0x1db   : > { %1370 = vmatprep.subr.bf16.mxu0 %v1499_v56 }
 0x1dc   : > { %v369_v52 = vmax.f32 %v353_v46, %v361_v50  ;;  %v417_v34 = vpop.permute.xlu0 %416 }
 0x1dd   : > { %1253 = vmatmul.mubr.f32.gmra.mrb[2].mxu1 %v365_v44 }
 0x1de   : > { %1255 = vmatprep.mubr.f32.mxu1 %v366_v47  ;;  %1372 = vmatpush3.bf16.msra.mxu0 %v1371_v5 }
 0x1df   : > { %1373 = vmatprep.subr.bf16.mxu0 %v1499_v56 }
 0x1e0   : > { %v427_v57 = vpop.permute.xlu0 %426 }
 0x1e1   : > { %1256 = vmatmul.mubr.f32.gmra.mrb[4].mxu1 %v367_v49 }
 0x1e2   : > { %1258 = vmatprep.mubr.f32.mxu1 %v368_v51  ;;  %1375 = vmatpush3.bf16.msra.mxu0 %v1374_v8  ;;  %v432_v51 = vpop.permute.xlu1 %431 }
 0x1e3   : > { %1376 = vmatprep.subr.bf16.mxu0 %v1499_v56 }
 0x1e5   : > { %1259 = vmatmul.mubr.f32.gmra.mrb[6].mxu1 %v369_v52 }
 0x1e6   : > { %1378 = vmatpush3.bf16.msra.mxu0 %v1377_v11 }
 0x1e7   : > { %1379 = vmatprep.subr.bf16.mxu0 %v1499_v56 }
 0x1ea   : > { %1381 = vmatpush3.bf16.msra.mxu0 %v1380_v14 }
 0x1eb   : > { %1382 = vmatprep.subr.bf16.mxu0 %v1499_v56 }
 0x2ac   : > { %v1251_v20 = vpop.f32.mrb[0].mxu1 }
 0x2ad   : > { %v506_v22 = vadd.f32 %v1251_v20, %v402_v18  ;;  %v500_v23 = vpop.f32.mrb[1].mxu1 }
 0x2ae   : > { %v501_v24 = vadd.f32 %v500_v23, %v397_v17 }
 0x2af   : > { %v545_v25 = vrot.slane %v506_v22, 4 }
 0x2b0   : > { %v539_v26 = vrot.slane %v501_v24, 4  ;;  %v1254_v27 = vpop.f32.mrb[2].mxu1 }
 0x2b1   : > { %v546_v28 = vmax.f32 %v506_v22, %v545_v25  ;;  %v516_v29 = vadd.f32 %v1254_v27, %v412_v19  ;;  %v510_v30 = vpop.f32.mrb[3].mxu1 }
 0x2b2   : > { %v540_v32 = vmax.f32 %v501_v24, %v539_v26  ;;  %v511_v33 = vadd.f32 %v510_v30, %v407_v21 }
 0x2b3   : > { %v547_v35 = vrot.slane %v546_v28, 2  ;;  %v557_v36 = vrot.slane %v516_v29, 4 }
 0x2b4   : > { %v541_v37 = vrot.slane %v540_v32, 2  ;;  %v551_v38 = vrot.slane %v511_v33, 4  ;;  %v1257_v39 = vpop.f32.mrb[4].mxu1 }
 0x2b5   : > { %v548_v40 = vmax.f32 %v546_v28, %v547_v35  ;;  %v558_v41 = vmax.f32 %v516_v29, %v557_v36  ;;  %v526_v42 = vadd.f32 %v1257_v39, %v422_v31  ;;  %v520_v43 = vpop.f32.mrb[5].mxu1 }
 0x2b6   : > { %v542_v44 = vmax.f32 %v540_v32, %v541_v37  ;;  %v552_v45 = vmax.f32 %v511_v33, %v551_v38  ;;  %v521_v46 = vadd.f32 %v520_v43, %v417_v34 }
 0x2b7   : > { %v549_v47 = vrot.slane %v548_v40, 1  ;;  %v559_v48 = vrot.slane %v558_v41, 2  ;;  %v569_v49 = vrot.slane %v526_v42, 4 }
 0x2b8   : > { %v543_v50 = vrot.slane %v542_v44, 1  ;;  %v553_v52 = vrot.slane %v552_v45, 2  ;;  %v563_v53 = vrot.slane %v521_v46, 4  ;;  %v1260_v54 = vpop.f32.mrb[6].mxu1 }
 0x2b9   : > { %v550_v55 = vmax.f32 %v548_v40, %v549_v47  ;;  %v560_v58 = vmax.f32 %v558_v41, %v559_v48  ;;  %v570_v59 = vmax.f32 %v526_v42, %v569_v49  ;;  %v536_v60 = vadd.f32 %v1260_v54, %v432_v51  ;;  %v530_v61 = vpop.f32.mrb[7].mxu1 }
 0x2ba   : > { %v544_v62 = vmax.f32 %v542_v44, %v543_v50  ;;  %v554_v63 = vmax.f32 %v552_v45, %v553_v52  ;;  %v564_v0 = vmax.f32 %v521_v46, %v563_v53  ;;  %v531_v1 = vadd.f32 %v530_v61, %v427_v57 }
 0x2bb   : > { %v588_v3 = vsub.f32 %v506_v22, %v550_v55  ;;  %v561_v4 = vrot.slane %v560_v58, 1  ;;  %v571_v5 = vrot.slane %v570_v59, 2  ;;  %v581_v6 = vrot.slane %v536_v60, 4 }
 0x2bc   : > { %v587_v7 = vsub.f32 %v501_v24, %v544_v62  ;;  %v555_v8 = vrot.slane %v554_v63, 1  ;;  %v565_v9 = vrot.slane %v564_v0, 2  ;;  %v575_v10 = vrot.slane %v531_v1, 4 }
 0x2bd   : > { %v597_v11 = vmul.f32 1.442695, %v588_v3  ;;  %v562_v12 = vmax.f32 %v560_v58, %v561_v4  ;;  %v572_v13 = vmax.f32 %v570_v59, %v571_v5  ;;  %v582_v14 = vmax.f32 %v536_v60, %v581_v6 }
 0x2be   : > { %v595_v17 = vmul.f32 1.442695, %v587_v7  ;;  %v556_v18 = vmax.f32 %v554_v63, %v555_v8  ;;  %v566_v19 = vmax.f32 %v564_v0, %v565_v9  ;;  %v576_v20 = vmax.f32 %v531_v1, %v575_v10 }
 0x2bf   : > { %1417 = vpow2.f32 %v597_v11  ;;  %v590_v21 = vsub.f32 %v516_v29, %v562_v12  ;;  %v573_v23 = vrot.slane %v572_v13, 1  ;;  %v583_v25 = vrot.slane %v582_v14, 2 }
 0x2c0   : > { %1419 = vpow2.f32 %v595_v17  ;;  %v589_v22 = vsub.f32 %v511_v33, %v556_v18  ;;  %v567_v26 = vrot.slane %v566_v19, 1  ;;  %v577_v27 = vrot.slane %v576_v20, 2 }
 0x2c1   : > { %v601_v24 = vmul.f32 1.442695, %v590_v21  ;;  %v574_v28 = vmax.f32 %v572_v13, %v573_v23  ;;  %v584_v30 = vmax.f32 %v582_v14, %v583_v25 }
 0x2c2   : > { %v599_v31 = vmul.f32 1.442695, %v589_v22  ;;  %v568_v32 = vmax.f32 %v566_v19, %v567_v26  ;;  %v578_v34 = vmax.f32 %v576_v20, %v577_v27 }
 0x2c3   : > { %1421 = vpow2.f32 %v601_v24  ;;  %v592_v35 = vsub.f32 %v526_v42, %v574_v28  ;;  %v585_v36 = vrot.slane %v584_v30, 1 }
 0x2c4   : > { %1423 = vpow2.f32 %v599_v31  ;;  %v591_v37 = vsub.f32 %v521_v46, %v568_v32  ;;  %v579_v38 = vrot.slane %v578_v34, 1 }
 0x2c5   : > { %v605_v39 = vmul.f32 1.442695, %v592_v35  ;;  %v586_v29 = vmax.f32 %v584_v30, %v585_v36 }
 0x2c6   : > { %v603_v40 = vmul.f32 1.442695, %v591_v37  ;;  %v580_v41 = vmax.f32 %v578_v34, %v579_v38 }
 0x2c7   : > { %1425 = vpow2.f32 %v605_v39  ;;  %v594_v33 = vsub.f32 %v536_v60, %v586_v29 }
 0x2c8   : > { %1427 = vpow2.f32 %v603_v40  ;;  %v593_v43 = vsub.f32 %v531_v1, %v580_v41 }
 0x2c9   : > { %v1785_v44 = vpop.eup %1417  ;;  %v609_v45 = vmul.f32 1.442695, %v594_v33 }
 0x2ca   : > { %v1787_v47 = vpop.eup %1419  ;;  %v617_v48 = vrot.slane %v1785_v44, 4  ;;  %v607_v42 = vmul.f32 1.442695, %v593_v43 }
 0x2cb   : > { %v611_v49 = vrot.slane %v1787_v47, 4  ;;  %1429 = vpow2.f32 %v609_v45 }
 0x2cc   : > { %v618_v46 = vadd.f32 %v1785_v44, %v617_v48  ;;  %1431 = vpow2.f32 %v607_v42 }
 0x2cd   : > { %v1792_v50 = vpop.eup %1421  ;;  %v612_v51 = vadd.f32 %v1787_v47, %v611_v49 }
 0x2ce   : > { %v1795_v52 = vpop.eup %1423  ;;  %v619_v53 = vrot.slane %v618_v46, 2  ;;  %v629_v54 = vrot.slane %v1792_v50, 4 }
 0x2cf   : > { %v613_v55 = vrot.slane %v612_v51, 2  ;;  %v623_v57 = vrot.slane %v1795_v52, 4 }
 0x2d0   : > { %v620_v58 = vadd.f32 %v619_v53, %v618_v46  ;;  %v630_v59 = vadd.f32 %v1792_v50, %v629_v54 }
 0x2d1   : > { %v1800_v60 = vpop.eup %1425  ;;  %v614_v61 = vadd.f32 %v613_v55, %v612_v51  ;;  %v624_v62 = vadd.f32 %v1795_v52, %v623_v57 }
 0x2d2   : > { %v1803_v63 = vpop.eup %1427  ;;  %v621_v0 = vrot.slane %v620_v58, 1  ;;  %v631_v1 = vrot.slane %v630_v59, 2  ;;  %v641_v3 = vrot.slane %v1800_v60, 4 }
 0x2d3   : > { %v615_v4 = vrot.slane %v614_v61, 1  ;;  %v625_v5 = vrot.slane %v624_v62, 2  ;;  %v635_v6 = vrot.slane %v1803_v63, 4 }
 0x2d4   : > { %v622_v7 = vadd.f32 %v621_v0, %v620_v58  ;;  %v632_v8 = vadd.f32 %v631_v1, %v630_v59  ;;  %v642_v9 = vadd.f32 %v1800_v60, %v641_v3 }
 0x2d5   : > { %v1808_v10 = vpop.eup %1429  ;;  %v616_v11 = vadd.f32 %v615_v4, %v614_v61  ;;  %v626_v12 = vadd.f32 %v625_v5, %v624_v62  ;;  %v636_v13 = vadd.f32 %v1803_v63, %v635_v6 }
 0x2d6   : > { %v1811_v14 = vpop.eup %1431  ;;  %1433 = vrcp.f32 %v622_v7  ;;  %v633_v17 = vrot.slane %v632_v8, 1  ;;  %v643_v18 = vrot.slane %v642_v9, 2  ;;  %v653_v19 = vrot.slane %v1808_v10, 4 }
 0x2d7   : > { %1435 = vrcp.f32 %v616_v11  ;;  %v627_v20 = vrot.slane %v626_v12, 1  ;;  %v637_v21 = vrot.slane %v636_v13, 2  ;;  %v647_v23 = vrot.slane %v1811_v14, 4 }
 0x2d8   : > { %v634_v25 = vadd.f32 %v633_v17, %v632_v8  ;;  %v644_v22 = vadd.f32 %v643_v18, %v642_v9  ;;  %v654_v26 = vadd.f32 %v1808_v10, %v653_v19 }
 0x2d9   : > { %v628_v27 = vadd.f32 %v627_v20, %v626_v12  ;;  %v638_v24 = vadd.f32 %v637_v21, %v636_v13  ;;  %v648_v28 = vadd.f32 %v1811_v14, %v647_v23 }
 0x2da   : > { %1437 = vrcp.f32 %v634_v25  ;;  %v645_v30 = vrot.slane %v644_v22, 1  ;;  %v655_v31 = vrot.slane %v654_v26, 2  ;;  %v1150_v25 = vld [vmem:[%s1911_s7] ss:$0 sm:$0xff] }
 0x2db   : > { %1439 = vrcp.f32 %v628_v27  ;;  %v639_v32 = vrot.slane %v638_v24, 1  ;;  %v649_v34 = vrot.slane %v648_v28, 2 }
 0x2dc   : > { %v646_v35 = vadd.f32 %v645_v30, %v644_v22  ;;  %v656_v36 = vadd.f32 %v655_v31, %v654_v26 }
 0x2dd   : > { %v640_v37 = vadd.f32 %v639_v32, %v638_v24  ;;  %v650_v38 = vadd.f32 %v649_v34, %v648_v28 }
 0x2de   : > { %v657_v39 = vrot.slane %v656_v36, 1  ;;  %1441 = vrcp.f32 %v646_v35 }
 0x2df   : > { %1443 = vrcp.f32 %v640_v37  ;;  %v651_v29 = vrot.slane %v650_v38, 1 }
 0x2e0   : > { %v1434_v40 = vpop.eup %1433  ;;  %v658_v41 = vadd.f32 %v657_v39, %v656_v36 }
 0x2e1   : > { %v1436_v33 = vpop.eup %1435  ;;  %v662_v43 = vmul.f32 %v1434_v40, %v1785_v44  ;;  %v652_v45 = vadd.f32 %v651_v29, %v650_v38 }
 0x2e2   : > { %v660_v48 = vmul.f32 %v1436_v33, %v1787_v47  ;;  %1445 = vrcp.f32 %v658_v41 }
 0x2e3   : > { %1447 = vrcp.f32 %v652_v45  ;;  %v676_v42 = vmul.f32 %v662_v43, %v1716_v16 }
 0x2e4   : > { %v1438_v49 = vpop.eup %1437  ;;  %v675_v46 = vmul.f32 %v660_v48, %v1716_v16 }
 0x2e5   : > { %v1440_v51 = vpop.eup %1439  ;;  %v666_v53 = vmul.f32 %v1438_v49, %v1792_v50  ;;  %v689_v54 = vrot.slane %v676_v42, 4 }
 0x2e6   : > { %v664_v55 = vmul.f32 %v1440_v51, %v1795_v52  ;;  %v683_v57 = vrot.slane %v675_v46, 4 }
 0x2e7   : > { %v678_v58 = vmul.f32 %v666_v53, %v1716_v16  ;;  %v690_v44 = vadd.f32 %v689_v54, %v676_v42 }
 0x2e8   : > { %v1442_v59 = vpop.eup %1441  ;;  %v677_v47 = vmul.f32 %v664_v55, %v1716_v16  ;;  %v684_v61 = vadd.f32 %v683_v57, %v675_v46 }
 0x2e9   : > { %v1444_v62 = vpop.eup %1443  ;;  %v670_v0 = vmul.f32 %v1442_v59, %v1800_v60  ;;  %v691_v1 = vrot.slane %v690_v44, 2  ;;  %v701_v3 = vrot.slane %v678_v58, 4 }
 0x2ea   : > { %v668_v4 = vmul.f32 %v1444_v62, %v1803_v63  ;;  %v685_v5 = vrot.slane %v684_v61, 2  ;;  %v695_v50 = vrot.slane %v677_v47, 4 }
 0x2eb   : > { %v680_v6 = vmul.f32 %v670_v0, %v1716_v16  ;;  %v692_v52 = vadd.f32 %v691_v1, %v690_v44  ;;  %v702_v7 = vadd.f32 %v701_v3, %v678_v58 }
 0x2ec   : > { %v1446_v8 = vpop.eup %1445  ;;  %v679_v9 = vmul.f32 %v668_v4, %v1716_v16  ;;  %v686_v11 = vadd.f32 %v685_v5, %v684_v61  ;;  %v696_v12 = vadd.f32 %v695_v50, %v677_v47 }
 0x2ed   : > { %v1448_v13 = vpop.eup %1447  ;;  %v674_v17 = vmul.f32 %v1446_v8, %v1808_v10  ;;  %v693_v60 = vrot.slane %v692_v52, 1  ;;  %v703_v18 = vrot.slane %v702_v7, 2  ;;  %v713_v19 = vrot.slane %v680_v6, 4 }
 0x2ee   : > { %v672_v63 = vmul.f32 %v1448_v13, %v1811_v14  ;;  %v687_v20 = vrot.slane %v686_v11, 1  ;;  %v697_v21 = vrot.slane %v696_v12, 2  ;;  %v707_v23 = vrot.slane %v679_v9, 4 }
 0x2ef   : > { %v682_v22 = vmul.f32 %v674_v17, %v1716_v16  ;;  %v694_v26 = vadd.f32 %v693_v60, %v692_v52  ;;  %v704_v27 = vadd.f32 %v703_v18, %v702_v7  ;;  %v714_v24 = vadd.f32 %v713_v19, %v680_v6 }
 0x2f0   : > { %v681_v28 = vmul.f32 %v672_v63, %v1716_v16  ;;  %v688_v10 = vadd.f32 %v687_v20, %v686_v11  ;;  %v698_v30 = vadd.f32 %v697_v21, %v696_v12  ;;  %v708_v31 = vadd.f32 %v707_v23, %v679_v9  ;;  %v870_v11 = vld [vmem:[%s1914_s10] sm:$0xff]  ;;  %v871_v12 = vld [vmem:[%s1914_s10 + $0x8] sm:$0xff]  ;;  %v872_v20 = vld [vmem:[%s1914_s10 + $0x10] sm:$0xff] }
 0x2f1   : > { %v705_v32 = vrot.slane %v704_v27, 1  ;;  %v715_v34 = vrot.slane %v714_v24, 2  ;;  %v725_v14 = vrot.slane %v682_v22, 4  ;;  %v739_v35 = vadd.f32 %v1150_v25, %v694_v26  ;;  %v873_v21 = vld [vmem:[%s1914_s10 + $0x18] sm:$0xff] }
 0x2f2   : > { %v699_v36 = vrot.slane %v698_v30, 1  ;;  %v709_v37 = vrot.slane %v708_v31, 2  ;;  %v719_v38 = vrot.slane %v681_v28, 4  ;;  %v738_v39 = vadd.f32 %v1150_v25, %v688_v10 }
 0x2f3   : > { %v706_v29 = vadd.f32 %v705_v32, %v704_v27  ;;  %v716_v40 = vadd.f32 %v715_v34, %v714_v24  ;;  %v726_v41 = vadd.f32 %v725_v14, %v682_v22  ;;  %v777_v33 = vrot.slane %v739_v35, 7  ;;  %v1155_v34 = vld [vmem:[#allocation6] ss:$0 sm:$0xff] }
 0x2f4   : > { %v700_v43 = vadd.f32 %v699_v36, %v698_v30  ;;  %v710_v45 = vadd.f32 %v709_v37, %v708_v31  ;;  %v720_v48 = vadd.f32 %v719_v38, %v681_v28  ;;  %v1383_v18 = vpack.c.bf16 %v871_v12, %v870_v11  ;;  %v1154_v28 = vld [vmem:[%s1916_s12] ss:$0 sm:$0xff] }
 0x2f5   : > { %v717_v42 = vrot.slane %v716_v40, 1  ;;  %v727_v16 = vrot.slane %v726_v41, 2  ;;  %v741_v49 = vadd.f32 %v1150_v25, %v706_v29  ;;  %v779_v46 = vsel %vm778_vm6, %v777_v33, %v738_v39  ;;  %v979_v39 = vld [vmem:[#allocation3] sm:$0xff] }
 0x2f6   : > { %v711_v51 = vrot.slane %v710_v45, 1  ;;  %v721_v53 = vrot.slane %v720_v48, 2  ;;  %v740_v54 = vadd.f32 %v1150_v25, %v700_v43  ;;  %v1386_v23 = vpack.c.bf16 %v873_v21, %v872_v20 }
 0x2f7   : > { %v718_v55 = vadd.f32 %v717_v42, %v716_v40  ;;  %v728_v57 = vadd.f32 %v727_v16, %v726_v41  ;;  %v783_v62 = vrot.slane %v741_v49, 5  ;;  %v987_v42 = vld [vmem:[#allocation4] sm:$0xff] }
 0x2f8   : > { %v712_v58 = vadd.f32 %v711_v51, %v710_v45  ;;  %v722_v44 = vadd.f32 %v721_v53, %v720_v48  ;;  %v780_v59 = vrot.slane %v740_v54, 6 }
 0x2f9   : > { %v729_v47 = vrot.slane %v728_v57, 1  ;;  %v743_v61 = vadd.f32 %v1150_v25, %v718_v55 }
 0x2fa   : > { %v723_v0 = vrot.slane %v722_v44, 1  ;;  %v742_v1 = vadd.f32 %v1150_v25, %v712_v58  ;;  %v782_v3 = vsel %vm781_vm7, %v780_v59, %v779_v46 }
 0x2fb   : > { %v730_v4 = vadd.f32 %v729_v47, %v728_v57  ;;  %v785_v5 = vsel %vm784_vm8, %v783_v62, %v782_v3  ;;  %v789_v7 = vrot.slane %v743_v61, 3 }
 0x2fc   : > { %v724_v50 = vadd.f32 %v723_v0, %v722_v44  ;;  %v786_v6 = vrot.slane %v742_v1, 4 }
 0x2fd   : > { %v745_v52 = vadd.f32 %v1150_v25, %v730_v4 }
 0x2fe   : > { %v744_v8 = vadd.f32 %v1150_v25, %v724_v50  ;;  %v788_v9 = vsel %vm787_vm9, %v786_v6, %v785_v5  ;;  %v1151_v25 = vld [vmem:[%s1913_s9] ss:$0 sm:$0xff] }
 0x2ff   : > { %v791_v13 = vsel %vm790_vm10, %v789_v7, %v788_v9  ;;  %v795_v60 = vrot.slane %v745_v52, 1 }
 0x300   : > { %v792_v17 = vrot.slane %v744_v8, 2 }
 0x302   : > { %v794_v19 = vsel %vm793_vm11, %v792_v17, %v791_v13 }
 0x303   : > { %v797_v63 = vsel %vm796_vm12, %v795_v60, %v794_v19 }
 0x304   : > { %1294 = vmatmul.mubr.f32.vlgmr.msra.gmra.mrb[2].mxu0 %v797_v63 }
 0x305   : > { %1384 = vmatpush3.bf16.msra.mxu0 %v1383_v18  ;;  %1304 = vmatprep.mubr.msk.f32.mxu0 %vm1500_vm5, %v1496_v15 }
 0x306   : > { %1385 = vmatprep.subr.bf16.mxu0 %v1499_v56  ;;  %v1152_v56 = vld [vmem:[%s1915_s11] ss:$0 sm:$0xff] }
 0x309   : > { %1387 = vmatpush3.bf16.msra.mxu0 %v1386_v23 }
 0x3d7   : > { %v865_v22 = vpop.f32.mrb[2].mxu0 }
 0x3d8   : > { %v866_v26 = vadd.f32 %v1151_v25, %v865_v22  ;;  %v1295_v27 = vpop.f32.mrb[3].mxu0 }
 0x3da   : > { %v869_v15 = vmax.f32 %v866_v26, 0.0 }
 0x3dc   : > { %1305 = vmatmul.mubr.msk.f32.vlgmr.msra.gmra.mrb[4].mxu0 %vm143_vm4, %v869_v15 }
 0x4af   : > { %v950_v24 = vpop.f32.mrb[4].mxu0 }
 0x4b0   : > { %v951_v10 = vadd.f32 %v1152_v56, %v950_v24  ;;  %v1306_v30 = vpop.f32.mrb[5].mxu0 }
 0x4b2   : > { %985 = vst.msk [vmem:[#allocation2] sm:$0xff] %vm143_vm4, %v951_v10  ;;  %v961_v31 = vmul.f32 %v1154_v28, %v951_v10 }
 0x4b4   : > { %v962_v32 = vsel %vm143_vm4, %v961_v31, 0.0 }
 0x4b5   : > { %963 = vadd.xlane.f32.xlu0 %v962_v32 }
 0x542   : > { %v964_v14 = vpop.xlane.xlu0 %963 }
 0x543   : > { %v972_v35 = vadd.f32 %v1155_v34, %v964_v14 }
 0x545   : > { %v1156_v36 = vmul.f32 -1.442695, %v972_v35 }
 0x547   : > { %1449 = vpow2.f32 %v1156_v36 }
 0x551   : > { %v1450_v37 = vpop.eup %1449 }
 0x552   : > { %v976_v38 = vadd.f32 1.0, %v1450_v37 }
 0x554   : > { %1451 = vrcp.f32 %v976_v38 }
 0x55e   : > { %v1452_v29 = vpop.eup %1451 }
 0x55f   : > { %v980_v40 = vadd.f32 %v1452_v29, %v979_v39 }
 0x561   : > { %v981_v41 = vmin.f32 %v980_v40, 1.0 }
 0x563   : > { %v982_v33 = vsub.f32 %v981_v41, %v979_v39 }
 0x565   : > { %v983_v43 = vmin.f32 %v1452_v29, %v982_v33 }
 0x567   : > { %990 = vperm.xlu0 %1415, %v983_v43   ;;  %v984_v45 = vadd.f32 %v983_v43, %v979_v39 }
 0x569   : > { %v996_v48 = vsel %vm145_vm0, %v984_v45, inf  ;;  %986 = vst.msk [vmem:[#allocation3] sm:$0xff] %vm145_vm0, %v984_v45 }
 0x56a   : > { %997 = vmin.xlane.f32.xlu1 %v996_v48 }
 0x5e6   : > { %v991_v16 = vpop.permute.xlu0 %990 }
 0x5e7   : > { %v993_v49 = vmul.f32 %v991_v16, %v951_v10 }
 0x5e9   : > { %v994_v46 = vadd.f32 %v993_v49, %v987_v42 }
 0x5eb   : > { %995 = vst.msk [vmem:[#allocation4] sm:$0xff] %vm143_vm4, %v994_v46 }
 0x5f7   : > { %v998_v51 = vpop.xlane.xlu1 %997 }
 0x5f8   : > { %v999_v53 = vrot.slane %v998_v51, 4 }
 0x5fa   : > { %v1000_v54 = vmin.f32 %v998_v51, %v999_v53 }
 0x5fc   : > { %v1001_v55 = vrot.slane %v1000_v54, 2 }
 0x5fe   : > { %v1002_v57 = vmin.f32 %v1000_v54, %v1001_v55 }
 0x600   : > { %v1003_v58 = vrot.slane %v1002_v57, 1 }
 0x602   : > { %v1004_v44 = vmin.f32 %v1002_v57, %v1003_v58 }
 0x604   : > { %1394 = vpush %v1004_v44 }
 0x635   : > { %s1395_s27 = spop %1394 }
 0x636   : > { %p1006_p1 = scmp.ge.f32.partialorder %s1395_s27, 1.0 }
 0x638   : > { %s1007_s2 = scalar_select %p1006_p1, 1, 0 }
 0x63a   : > { %1008 = sst [smem:[#allocation5]] %s1007_s2 }
 0x63b PF: > { %s155_s29 = sadd.s32 1, %s1491_s29  }
 0x63c   : > { %p152_p2 = scmp.ge.s32.totalorder %s155_s29, 8  }
 0x63d   :  { %v1010_v59 = vld [vmem:[%s1918_s14] sm:$0xff] (%p152_p2)  ;;  %v1011_v47 = vld [vmem:[%s1918_s14 + $0x8] sm:$0xff] (%p152_p2)  ;;  %v1012_v61 = vld [vmem:[%s1918_s14 + $0x10] sm:$0xff] (%p152_p2)  ;;  %1315 = vmatprep.mubr.msk.f32.mxu0 (%p152_p2), %vm1494_vm3, %v1493_v2  ;;  %v1501_v62 = vmov (%p152_p2), 0.0|0.0   ;;  %vm1106_vm13 = vcmask (%p152_p2), 64544   ;;  %s1502_s5 = smov (%p152_p2), 124  }
 0x63e   :  { %154 = sbr.rel (!%p152_p2) target bundleno = 226 (0xe2), region = 96  ;;  %1388 = vmatprep.subr.bf16.mxu0 (%p152_p2), %v1501_v62  ;;  %v1389_v0 = vpack.c.bf16 (%p152_p2), %v1011_v47, %v1010_v59  ;;  %v1013_v1 = vld [vmem:[%s1918_s14 + $0x18] sm:$0xff] (%p152_p2)  ;;  %v1009_v4 = vld [vmem:[#allocation4] sm:$0xff] (%p152_p2)  ;;  %v1157_v5 = vld [vmem:[%s1919_s15] ss:$0 sm:$0xff] (%p152_p2)  ;;  %s1503_s6 = smov (%p152_p2), [#allocation7]  }
 0x63f   :  { %v1392_v3 = vpack.c.bf16 (%p152_p2), %v1013_v1, %v1012_v61  ;;  %s1132_s7 = sshll.u32 (%p152_p2), %s1503_s6, 4  ;;  %vm1124_vm14 = vcmask (%p152_p2), 64512   ;;  %s1133_s7 = int_to_ptr.vmem [resolvable:$true] %s1132_s7 }
 0x640   :  { %1390 = vmatpush3.bf16.msra.mxu0 (%p152_p2), %v1389_v0  ;;  %s1461_s8 = scalar_lea.vmem (%p152_p2), %s1133_s7, 128  ;;  %p1466_p4 = scmp.lt.s32.totalorder (%p152_p2), %s1133_s7, %s1133_s7 }
 0x641   :  { %1391 = vmatprep.subr.bf16.mxu0 (%p152_p2), %v1501_v62  ;;  %p1462_p3 = scmp.ne.s32.totalorder (%p152_p2), %s1133_s7, %s1461_s8  ;;  %p1467_p5 = scmp.lt.s32.totalorder (%p152_p2), %s1461_s8, %s1461_s8 }
 0x643   :  { %p1468_p6 = por (%p152_p2), %p1467_p5, %p1466_p4 }
 0x644   :  { %1393 = vmatpush3.bf16.msra.mxu0 (%p152_p2), %v1392_v3 }
 0x645   :  { %p1469_p7 = pnand %p1468_p6, %p1462_p3 }
 0x647   :  { %1316 = vmatmul.mubr.msk.f32.vlgmr.msra.gmra.mrb[0].mxu0 %vm143_vm4, %v1009_v4 }
 0x71a   :  { %v1090_v50 = vpop.f32.mrb[0].mxu0 }
 0x71b   :  { %v1091_v2 = vadd.f32 %v1157_v5, %v1090_v50  ;;  %v1317_v6 = vpop.f32.mrb[1].mxu0 }
 0x71d   :  { %v1107_v52 = vsel %vm1106_vm13, %v1091_v2, -inf  ;;  %v1094_v7 = vsel %vm65_vm2, %v1091_v2, -inf }
 0x71e   :  { %1108 = vmax.xlane.f32.xlu0 %v1107_v52 }
 0x722   :  { %1095 = vmax.xlane.f32.xlu0 %v1094_v7 }
 0x7ab   :  { %v1109_v8 = vpop.xlane.xlu0 %1108 }
 0x7ac   :  { %v1110_v9 = vsub.f32 %v1091_v2, %v1109_v8 }
 0x7ae   :  { %v1111_v11 = vmul.f32 1.442695, %v1110_v9 }
 0x7af   :  { %v1096_v13 = vpop.xlane.xlu0 %1095 }
 0x7b0   :  { %1453 = vpow2.f32 %v1111_v11  ;;  %v1097_v17 = vsub.f32 %v1091_v2, %v1096_v13 }
 0x7b2   :  { %v1098_v60 = vmul.f32 1.442695, %v1097_v17 }
 0x7b4   :  { %1455 = vpow2.f32 %v1098_v60 }
 0x7ba   :  { %v1454_v12 = vpop.eup %1453 }
 0x7bb   :  { %1114 = vrot.lane.b32.xlu1 %v1454_v12, %s1502_s5 }
 0x7be   :  { %v1456_v18 = vpop.eup %1455 }
 0x7bf   :  { %v1100_v19 = vsel %vm65_vm2, %v1456_v18, 0.0 }
 0x7df   :  { %1101 = vadd.xlane.f32.xlu1 %v1100_v19 }
 0x82d   :  { %v1115_v63 = vpop.permute.xlu1 %1114 }
 0x82e   :  { %v1117_v20 = vsel %vm65_vm2, %v1115_v63, 0.0 }
 0x82f   :  { %1118 = vadd.xlane.f32.xlu0 %v1117_v20 }
 0x86c   :  { %v1102_v21 = vpop.xlane.xlu1 %1101 }
 0x86d   :  { %1457 = vlog2.f32 %v1102_v21 }
 0x877   :  { %v1458_v25 = vpop.eup %1457 }
 0x878   :  { %v1104_v22 = vmul.f32 0.6931472, %v1458_v25 }
 0x87a   :  { %v1105_v15 = vsub.f32 %v1097_v17, %v1104_v22 }
 0x8bc   :  { %v1119_v23 = vpop.xlane.xlu0 %1118 }
 0x8bd   :  { %1459 = vlog2.f32 %v1119_v23 }
 0x8c7   :  { %v1460_v26 = vpop.eup %1459 }
 0x8c8   :  { %v1121_v27 = vmul.f32 0.6931472, %v1460_v26 }
 0x8ca   :  { %v1122_v56 = vsub.f32 %v1110_v9, %v1121_v27 }
 0x8cc   :  { %v1123_v24 = vsel %vm65_vm2, %v1105_v15, %v1122_v56 }
 0x8cd   :  { %1125 = vst.msk [vmem:[#allocation7] sm:$0xff] %vm1124_vm14, %v1123_v24 }
 0x8ce   :  { %1472 = shalt.err (!%p1469_p7)
}
 0x8cf   :  { %s1473_s11 = scalar_lea.hbm %s1920_s16, 128 }
 0x8d0   :  { %p1474_p8 = scmp.ne.s32.totalorder %s1920_s16, %s1473_s11  ;;  %p1477_p9 = scmp.lt.u32.totalorder %s1473_s11, %s1920_s16 }
 0x8d2   :  { %p1479_p10 = pnand %p1477_p9, %p1474_p8 }
 0x8d4   :  { %1482 = shalt.err (!%p1479_p10)
}
 0x8d5   :  { %1135 = dma.vmem_to_hbm [thread:$0]  %s1133_s7, 128, %s1920_s16, [#allocation8]  }
 0x8d6   :  { %1487 = dma.done.wait [#allocation8], 128  }
 0x8d7   :  { %1488 = vsyncadd [#allocation8], 4294967168 }
 0x8d8   :  { %1139 = vsyncpa [#allocation8], 1 }

</bundles_post_ra>
